<compile_context>
chip_gen: v7x
topology: tpu7x:2x2x1
jax: 0.10.0
libtpu: 0.0.40
codegen_flags: <defaults>
</compile_context>

<pallas_src>
import math

import jax
import jax.numpy as jnp
from jax.experimental import pallas as pl
from jax.experimental.pallas import tpu as pltpu

_LANE = 128
_MAX_LANES = 4096                       # lane-dense cap for the flat 2D view
_TARGET_TILE_BYTES = 4 * 1024 * 1024    # ~4 MiB/tile; 4 buffers ~ 16 MiB VMEM
_VMEM_LIMIT_BYTES = 32 * 1024 * 1024


def _copy_kernel(x_ref, o_ref):
    # Straight identity copy of the current VMEM tile.
    o_ref[...] = x_ref[...]


def _sublane_multiple(dtype) -> int:
    # Packed sublane multiple: 8 rows for 32-bit, 16 for 16-bit, 32 for 8-bit.
    return max(8, 32 // jnp.dtype(dtype).itemsize)


def _pick_tile_rows(rows: int, sub: int, max_rows: int) -> int:
    """Largest sub-aligned row tile <= max_rows, preferring exact divisors."""
    max_rows = max(sub, (max_rows // sub) * sub)
    if rows <= max_rows:
        return rows
    # Prefer a tile that evenly divides `rows` (no ragged last tile).
    t = max_rows
    while t >= sub:
        if rows % t == 0:
            return t
        t -= sub
    # No clean divisor: accept a ragged last tile (Pallas masks it).
    return max_rows


def _flat_copy(x2d):
    """Identity copy of a (rows, lanes) row-major view of the buffer."""
    rows, lanes = x2d.shape
    itemsize = jnp.dtype(x2d.dtype).itemsize
    sub = _sublane_multiple(x2d.dtype)

    max_rows = _TARGET_TILE_BYTES // (lanes * itemsize)
    tile_rows = _pick_tile_rows(rows, sub, max_rows)

    if tile_rows == rows:
        # Small tensor: split into 2 packed-aligned blocks if that is clean
        # (keeps both v7x TensorCores busy), else one full-extent block.
        if rows % (2 * sub) == 0 and rows >= 2 * sub:
            tile_rows = rows // 2

    grid = (pl.cdiv(rows, tile_rows),)

    return pl.pallas_call(
        _copy_kernel,
        out_shape=jax.ShapeDtypeStruct((rows, lanes), x2d.dtype),
        grid_spec=pltpu.PrefetchScalarGridSpec(
            num_scalar_prefetch=0,
            grid=grid,
            in_specs=[pl.BlockSpec((tile_rows, lanes), lambda i: (i, 0))],
            out_specs=pl.BlockSpec((tile_rows, lanes), lambda i: (i, 0)),
        ),
        input_output_aliases={0: 0},
        compiler_params=pltpu.CompilerParams(
            dimension_semantics=("parallel",),
            vmem_limit_bytes=_VMEM_LIMIT_BYTES,
        ),
        cost_estimate=pl.CostEstimate(
            flops=0,
            transcendentals=0,
            bytes_accessed=2 * rows * lanes * itemsize,
        ),
    )(x2d)


class Reshape:
    """JAX/Pallas equivalent of the PyTorch Reshape(nn.Module)."""

    def __init__(self, *args):
        self.shape = args

    def __call__(self, x):
        x = jnp.asarray(x)
        total = math.prod(x.shape)

        # Resolve a possible -1 in the target shape (torch.view allows it).
        shape = list(self.shape)
        if -1 in shape:
            idx = shape.index(-1)
            known = math.prod(d for d in shape if d != -1)
            if known == 0:
                raise ValueError("cannot infer -1 dimension with zero-sized known dims")
            shape[idx] = total // known
        shape = tuple(shape)
        if math.prod(shape) != total:
            raise ValueError("view shape incompatible with input")

        if total == 0 or total % _LANE != 0:
            # Contiguous view is metadata-only; padding + copying would only
            # add HBM traffic.  No Pallas work needed.
            return jnp.reshape(x, shape)

        # Pick the largest lane-dense last dim (multiple of 128, <= 4096) that
        # divides the element count, while keeping rows >= one packed sublane
        # group when possible (full-vreg tiles for tiny tensors).
        sub = _sublane_multiple(x.dtype)
        lanes = _LANE
        while (
            lanes * 2 <= _MAX_LANES
            and total % (lanes * 2) == 0
            and total // (lanes * 2) >= sub
        ):
            lanes *= 2

        copied = _flat_copy(x.reshape(total // lanes, lanes))

        # Metadata-only shape change (matches torch .view on contiguous data).
        return copied.reshape(shape)


if __name__ == "__main__":
    key = jax.random.PRNGKey(0)
    x = jax.random.normal(key, (2, 4, 16, 16), dtype=jnp.float32)

    # Reshape NCHW -> (N, C, H*W), same element order as torch .view.
    module = Reshape(2, 4, 256)
    y = module(x)
    y = jax.block_until_ready(y)

    ref = x.reshape(2, 4, 256)
    assert y.shape == (2, 4, 256)
    assert y.dtype == x.dtype
    assert bool(jnp.all(y == ref))

    # Also exercise -1 resolution, like torch .view(B, -1).
    y2 = jax.block_until_ready(Reshape(2, -1)(x))
    assert y2.shape == (2, 4 * 16 * 16)
    assert bool(jnp.all(y2 == x.reshape(2, -1)))

    # Larger, multi-tile case to exercise the grid path.
    x3 = jax.random.normal(jax.random.PRNGKey(1), (8, 32, 32, 16), dtype=jnp.float32)
    y3 = jax.block_until_ready(Reshape(8, -1)(x3))
    assert y3.shape == (8, 32 * 32 * 16)
    assert bool(jnp.all(y3 == x3.reshape(8, -1)))

    print("KERNEL_OK")
</pallas_src>

<mosaic_0001>
module attributes {stable_mosaic.version = 11 : i64} {
  func.func @_copy_kernel(%arg0: i32, %arg1: memref<8x256xf32, #tpu.memory_space<vmem>>, %arg2: memref<8x256xf32, #tpu.memory_space<vmem>>) attributes {dimension_semantics = [#tpu.dimension_semantics<parallel>], iteration_bounds = array<i64: 1>, scalar_prefetch = 0 : i64, scratch_operands = 0 : i64, tpu.core_type = #tpu.core_type<tc>, window_params = [{transform_indices = @transform_0, window_bounds = array<i64: 8, 256>}, {transform_indices = @transform_1, window_bounds = array<i64: 8, 256>}]} {
    %c0 = arith.constant 0 : index
    %c0_0 = arith.constant 0 : index
    %0 = vector.load %arg1[%c0, %c0_0] : memref<8x256xf32, #tpu.memory_space<vmem>>, vector<8x256xf32>
    %c0_1 = arith.constant 0 : index
    %c0_2 = arith.constant 0 : index
    %1 = vector.load %arg2[%c0_1, %c0_2] : memref<8x256xf32, #tpu.memory_space<vmem>>, vector<8x256xf32>
    tpu.vector_store %arg2[%c0_1, %c0_2], %0 {strides = array<i32>} : memref<8x256xf32, #tpu.memory_space<vmem>>, vector<8x256xf32>,
    return
  }
  func.func @transform_0(%arg0: i32) -> (i32, i32) {
    %c0_i32 = arith.constant 0 : i32
    %c0_i32_0 = arith.constant 0 : i32
    return %arg0, %c0_i32 : i32, i32
  }
  func.func @transform_1(%arg0: i32) -> (i32, i32) {
    %c0_i32 = arith.constant 0 : i32
    %c0_i32_0 = arith.constant 0 : i32
    return %arg0, %c0_i32 : i32, i32
  }
}

</mosaic_0001>

<bundles_post_ra>
// kernel: tpu_custom_call.1
= control target key start
LH: loop header
LB: loop body
LE: loop exit
PB: predicated region body
PF: predicated region fallthrough
CT: control target
= control target key end

     0   :  { %6 = vsyncpa [#allocation3], 0  ;;  %s126_s0 = inlined_call_operand.hbm [shape: f32[8,256], index: 0, kind: input, shape index: {}, may-alias: {0,1}]   ;;  %s127_s1 = inlined_call_operand.hbm [shape: f32[8,256], index: 1, kind: output, shape index: {}, may-alias: {0,1}]  }
   0x1   :  { %7 = vsyncpa [#allocation4], 0  ;;  %s90_s6 = smov [#allocation2]   ;;  %s42_s10 = scalar_lea.hbm %s126_s0, 256 }
   0x2   :  { %s14_s7 = sshll.u32 %s90_s6, 4  ;;  %p43_p0 = scmp.ne.s32.totalorder %s126_s0, %s42_s10  ;;  %s15_s7 = int_to_ptr.vmem [resolvable:$true] %s14_s7 }
   0x3   :  { %p46_p1 = scmp.lt.u32.totalorder %s42_s10, %s126_s0 }
   0x5   :  { %p48_p2 = pnand %p46_p1, %p43_p0 }
   0x7   :  { %51 = shalt.err (!%p48_p2)
}
   0x8   :  { %s52_s15 = scalar_lea.vmem %s15_s7, 256  ;;  %p57_p4 = scmp.lt.s32.totalorder %s15_s7, %s15_s7 }
   0x9   :  { %p53_p3 = scmp.ne.s32.totalorder %s15_s7, %s52_s15  ;;  %p58_p5 = scmp.lt.s32.totalorder %s52_s15, %s52_s15 }
   0xb   :  { %p59_p6 = por %p58_p5, %p57_p4 }
   0xd   :  { %p60_p7 = pnand %p59_p6, %p53_p3 }
   0xf   :  { %63 = shalt.err (!%p60_p7)
}
  0x10   :  { %17 = dma.hbm_to_vmem [thread:$0]  %s126_s0, 256, %s15_s7, [#allocation3]  }
  0x11   :  { %86 = dma.done.wait [#allocation3], 256  }
  0x12   :  { %87 = vsyncadd [#allocation3], 4294967040  ;;  %s91_s18 = smov [#allocation5]   ;;  %v21_v0 = vld [vmem:[#allocation2] sm:$0xff]  ;;  %v22_v1 = vld [vmem:[#allocation2 + $0x8] sm:$0xff] }
  0x13   :  { %s31_s19 = sshll.u32 %s91_s18, 4  ;;  %23 = vst [vmem:[#allocation5] sm:$0xff] %v21_v0  ;;  %24 = vst [vmem:[#allocation5 + $0x8] sm:$0xff] %v22_v1  ;;  %s32_s19 = int_to_ptr.vmem [resolvable:$true] %s31_s19 }
  0x14   :  { %s64_s20 = scalar_lea.vmem %s32_s19, 256  ;;  %p69_p9 = scmp.lt.s32.totalorder %s32_s19, %s32_s19 }
  0x15   :  { %p65_p8 = scmp.ne.s32.totalorder %s32_s19, %s64_s20  ;;  %p70_p10 = scmp.lt.s32.totalorder %s64_s20, %s64_s20 }
  0x17   :  { %p71_p11 = por %p70_p10, %p69_p9 }
  0x19   :  { %p72_p12 = pnand %p71_p11, %p65_p8 }
  0x1b   :  { %75 = shalt.err (!%p72_p12)
}
  0x1c   :  { %s76_s0 = scalar_lea.hbm %s127_s1, 256 }
  0x1d   :  { %p77_p13 = scmp.ne.s32.totalorder %s127_s1, %s76_s0  ;;  %p80_p0 = scmp.lt.u32.totalorder %s76_s0, %s127_s1 }
  0x1f   :  { %p82_p1 = pnand %p80_p0, %p77_p13 }
  0x21   :  { %85 = shalt.err (!%p82_p1)
}
  0x22   :  { %34 = dma.vmem_to_hbm [thread:$0]  %s32_s19, 256, %s127_s1, [#allocation4]  }
  0x23   :  { %88 = dma.done.wait [#allocation4], 256  }
  0x24   :  { %89 = vsyncadd [#allocation4], 4294967040 }
  0x25   :  { %38 = vsyncpa [#allocation3], 1 }
  0x26   :  { %39 = vsyncpa [#allocation4], 1 }

</bundles_post_ra>
